<compile_context>
chip_gen: v7x
topology: tpu7x:2x2x1
jax: 0.10.0
libtpu: 0.0.40
codegen_flags: <defaults>
</compile_context>

<pallas_src>
import jax
import jax.numpy as jnp
from jax import lax
from jax.experimental import pallas as pl
from jax.experimental.pallas import tpu as pltpu

_LN_EPS = 1e-12


def _fc_layernorm_kernel(x_ref, w_ref, b_ref, g_ref, beta_ref, o_ref):
    # x_ref: (TM, K)   w_ref: (K, H)   b/g/beta: (1, H)   o_ref: (TM, H)
    y = jnp.dot(x_ref[...], w_ref[...], preferred_element_type=jnp.float32)
    y = y + b_ref[...]                                   # f32 bias add

    # LayerNorm over the feature (last) axis, eps=1e-12, all in f32.
    mean = jnp.mean(y, axis=-1, keepdims=True)
    yc = y - mean
    var = jnp.mean(yc * yc, axis=-1, keepdims=True)
    inv = lax.rsqrt(var + _LN_EPS)
    out = yc * inv * g_ref[...] + beta_ref[...]

    o_ref[...] = out.astype(o_ref.dtype)


def visual_feat_encoder_candi_angle_forward(
    visn_input, fc_weight, fc_bias, ln_gamma, ln_beta, *, tile_m=512
):
    """Fused Linear(128->H) + LayerNorm(H, eps=1e-12).

    visn_input: (..., 128)
    fc_weight:  (H, 128)   (PyTorch nn.Linear layout)
    fc_bias:    (H,)
    ln_gamma:   (H,)
    ln_beta:    (H,)
    returns:    (..., H)
    """
    # TODO(synk): nn.Dropout is identity at inference; training-mode dropout
    # (RNG masking) is not implemented here.
    *lead, K = visn_input.shape
    H = fc_weight.shape[0]
    M = 1
    for d in lead:
        M *= d

    x2d = visn_input.reshape(M, K)
    w = fc_weight.T.astype(visn_input.dtype)             # (K, H), resident
    b2d = fc_bias.reshape(1, H).astype(jnp.float32)
    g2d = ln_gamma.reshape(1, H).astype(jnp.float32)
    beta2d = ln_beta.reshape(1, H).astype(jnp.float32)

    # Row-tile size: multiple of 8, capped so tiny inputs use one exact block.
    tm = min(tile_m, ((M + 7) // 8) * 8)
    grid_m = pl.cdiv(M, tm)

    out2d = pl.pallas_call(
        _fc_layernorm_kernel,
        out_shape=jax.ShapeDtypeStruct((M, H), visn_input.dtype),
        grid_spec=pltpu.PrefetchScalarGridSpec(
            num_scalar_prefetch=0,
            grid=(grid_m,),
            in_specs=[
                pl.BlockSpec((tm, K), lambda i: (i, 0)),   # streamed rows
                pl.BlockSpec((K, H), lambda i: (0, 0)),    # resident weight
                pl.BlockSpec((1, H), lambda i: (0, 0)),    # resident bias
                pl.BlockSpec((1, H), lambda i: (0, 0)),    # resident gamma
                pl.BlockSpec((1, H), lambda i: (0, 0)),    # resident beta
            ],
            out_specs=pl.BlockSpec((tm, H), lambda i: (i, 0)),
        ),
        compiler_params=pltpu.CompilerParams(
            dimension_semantics=("parallel",),
        ),
    )(x2d, w, b2d, g2d, beta2d)

    return out2d.reshape(*lead, H)


if __name__ == "__main__":
    # Small shapes consistent with the module: in_features = 128 (fixed by
    # nn.Linear(128, hidden)), hidden_size = 32, batch = 2, seq = 8.
    batch, seq, hidden, in_features = 2, 8, 32, 128

    key = jax.random.PRNGKey(0)
    k_x, k_w, k_b, k_g, k_beta = jax.random.split(key, 5)

    bound = 1.0 / (in_features ** 0.5)
    fc_weight = jax.random.uniform(k_w, (hidden, in_features), jnp.float32, -bound, bound)
    fc_bias = jax.random.uniform(k_b, (hidden,), jnp.float32, -bound, bound)
    # LayerNorm params (perturbed from the identity init for a stronger check).
    ln_gamma = 1.0 + 0.1 * jax.random.normal(k_g, (hidden,), jnp.float32)
    ln_beta = 0.1 * jax.random.normal(k_beta, (hidden,), jnp.float32)

    visn_input = jax.random.normal(k_x, (batch, seq, in_features), jnp.float32)

    out = visual_feat_encoder_candi_angle_forward(
        visn_input, fc_weight, fc_bias, ln_gamma, ln_beta
    )
    out = jax.block_until_ready(out)

    # Plain-JAX reference.
    y = visn_input @ fc_weight.T + fc_bias
    mean = y.mean(-1, keepdims=True)
    var = ((y - mean) ** 2).mean(-1, keepdims=True)
    ref = (y - mean) / jnp.sqrt(var + _LN_EPS) * ln_gamma + ln_beta

    assert out.shape == (batch, seq, hidden)
    assert jnp.allclose(out, ref, atol=2e-4, rtol=2e-4)

    print("KERNEL_OK")
</pallas_src>

<mosaic_0001>
module attributes {stable_mosaic.version = 11 : i64} {
  func.func @_fc_layernorm_kernel(%arg0: i32, %arg1: memref<16x128xf32, #tpu.memory_space<vmem>>, %arg2: memref<128x32xf32, #tpu.memory_space<vmem>>, %arg3: memref<1x32xf32, #tpu.memory_space<vmem>>, %arg4: memref<1x32xf32, #tpu.memory_space<vmem>>, %arg5: memref<1x32xf32, #tpu.memory_space<vmem>>, %arg6: memref<16x32xf32, #tpu.memory_space<vmem>>) attributes {dimension_semantics = [#tpu.dimension_semantics<parallel>], iteration_bounds = array<i64: 1>, scalar_prefetch = 0 : i64, scratch_operands = 0 : i64, tpu.core_type = #tpu.core_type<tc>, window_params = [{transform_indices = @transform_0, window_bounds = array<i64: 16, 128>}, {pipeline_mode = #tpu.pipeline_mode<synchronous>, transform_indices = @transform_1, window_bounds = array<i64: 128, 32>}, {pipeline_mode = #tpu.pipeline_mode<synchronous>, transform_indices = @transform_2, window_bounds = array<i64: 1, 32>}, {pipeline_mode = #tpu.pipeline_mode<synchronous>, transform_indices = @transform_3, window_bounds = array<i64: 1, 32>}, {pipeline_mode = #tpu.pipeline_mode<synchronous>, transform_indices = @transform_4, window_bounds = array<i64: 1, 32>}, {transform_indices = @transform_5, window_bounds = array<i64: 16, 32>}]} {
    %c0 = arith.constant 0 : index
    %c0_0 = arith.constant 0 : index
    %0 = vector.load %arg1[%c0, %c0_0] : memref<16x128xf32, #tpu.memory_space<vmem>>, vector<16x128xf32>
    %c0_1 = arith.constant 0 : index
    %c0_2 = arith.constant 0 : index
    %1 = vector.load %arg2[%c0_1, %c0_2] : memref<128x32xf32, #tpu.memory_space<vmem>>, vector<128x32xf32>
    %cst = arith.constant dense<0.000000e+00> : vector<16x32xf32>
    %2 = tpu.matmul %0, %1, %cst {dimension_numbers = #tpu.dot_dimension_numbers<[1], [0], [0], [1], [0, 0, 1, 1], [], []>} : vector<16x128xf32>, vector<128x32xf32>, vector<16x32xf32> -> vector<16x32xf32>
    %c0_3 = arith.constant 0 : index
    %c0_4 = arith.constant 0 : index
    %3 = vector.load %arg3[%c0_3, %c0_4] : memref<1x32xf32, #tpu.memory_space<vmem>>, vector<1x32xf32>
    %4 = vector.broadcast %3 : vector<1x32xf32> to vector<16x32xf32>
    %5 = arith.addf %2, %4 : vector<16x32xf32>
    %cst_5 = arith.constant dense<0.000000e+00> : vector<16xf32>
    %6 = vector.multi_reduction <add>, %5, %cst_5 [1] : vector<16x32xf32> to vector<16xf32>
    %7 = vector.shape_cast %6 : vector<16xf32> to vector<16x1xf32>
    %cst_6 = arith.constant 3.200000e+01 : f32
    %8 = vector.broadcast %cst_6 : f32 to vector<16x1xf32>
    %9 = arith.divf %7, %8 : vector<16x1xf32>
    %10 = vector.broadcast %9 : vector<16x1xf32> to vector<16x32xf32>
    %11 = arith.subf %5, %10 : vector<16x32xf32>
    %12 = arith.mulf %11, %11 : vector<16x32xf32>
    %cst_7 = arith.constant dense<0.000000e+00> : vector<16xf32>
    %13 = vector.multi_reduction <add>, %12, %cst_7 [1] : vector<16x32xf32> to vector<16xf32>
    %14 = vector.shape_cast %13 : vector<16xf32> to vector<16x1xf32>
    %cst_8 = arith.constant 3.200000e+01 : f32
    %15 = vector.broadcast %cst_8 : f32 to vector<16x1xf32>
    %16 = arith.divf %14, %15 : vector<16x1xf32>
    %cst_9 = arith.constant 9.99999996E-13 : f32
    %17 = vector.broadcast %cst_9 : f32 to vector<16x1xf32>
    %18 = arith.addf %16, %17 : vector<16x1xf32>
    %19 = math.rsqrt %18 : vector<16x1xf32>
    %20 = vector.broadcast %19 : vector<16x1xf32> to vector<16x32xf32>
    %21 = arith.mulf %11, %20 : vector<16x32xf32>
    %c0_10 = arith.constant 0 : index
    %c0_11 = arith.constant 0 : index
    %22 = vector.load %arg4[%c0_10, %c0_11] : memref<1x32xf32, #tpu.memory_space<vmem>>, vector<1x32xf32>
    %23 = vector.broadcast %22 : vector<1x32xf32> to vector<16x32xf32>
    %24 = arith.mulf %21, %23 : vector<16x32xf32>
    %c0_12 = arith.constant 0 : index
    %c0_13 = arith.constant 0 : index
    %25 = vector.load %arg5[%c0_12, %c0_13] : memref<1x32xf32, #tpu.memory_space<vmem>>, vector<1x32xf32>
    %26 = vector.broadcast %25 : vector<1x32xf32> to vector<16x32xf32>
    %27 = arith.addf %24, %26 : vector<16x32xf32>
    %c0_14 = arith.constant 0 : index
    %c0_15 = arith.constant 0 : index
    %28 = vector.load %arg6[%c0_14, %c0_15] : memref<16x32xf32, #tpu.memory_space<vmem>>, vector<16x32xf32>
    tpu.vector_store %arg6[%c0_14, %c0_15], %27 {strides = array<i32>} : memref<16x32xf32, #tpu.memory_space<vmem>>, vector<16x32xf32>,
    return
  }
  func.func @transform_0(%arg0: i32) -> (i32, i32) {
    %c0_i32 = arith.constant 0 : i32
    %c0_i32_0 = arith.constant 0 : i32
    return %arg0, %c0_i32 : i32, i32
  }
  func.func @transform_1(%arg0: i32) -> (i32, i32) {
    %c0_i32 = arith.constant 0 : i32
    %c0_i32_0 = arith.constant 0 : i32
    %c0_i32_1 = arith.constant 0 : i32
    return %c0_i32, %c0_i32_0 : i32, i32
  }
  func.func @transform_2(%arg0: i32) -> (i32, i32) {
    %c0_i32 = arith.constant 0 : i32
    %c0_i32_0 = arith.constant 0 : i32
    %c0_i32_1 = arith.constant 0 : i32
    return %c0_i32, %c0_i32_0 : i32, i32
  }
  func.func @transform_3(%arg0: i32) -> (i32, i32) {
    %c0_i32 = arith.constant 0 : i32
    %c0_i32_0 = arith.constant 0 : i32
    %c0_i32_1 = arith.constant 0 : i32
    return %c0_i32, %c0_i32_0 : i32, i32
  }
  func.func @transform_4(%arg0: i32) -> (i32, i32) {
    %c0_i32 = arith.constant 0 : i32
    %c0_i32_0 = arith.constant 0 : i32
    %c0_i32_1 = arith.constant 0 : i32
    return %c0_i32, %c0_i32_0 : i32, i32
  }
  func.func @transform_5(%arg0: i32) -> (i32, i32) {
    %c0_i32 = arith.constant 0 : i32
    %c0_i32_0 = arith.constant 0 : i32
    return %arg0, %c0_i32 : i32, i32
  }
}

</mosaic_0001>

<bundles_post_ra>
// kernel: tpu_custom_call.1
= control target key start
LH: loop header
LB: loop body
LE: loop exit
PB: predicated region body
PF: predicated region fallthrough
CT: control target
= control target key end

     0   :  { %s418_s0 = inlined_call_operand.vmem [shape: f32[16,128], index: 0, kind: input, shape index: {}]   ;;  %s419_s1 = inlined_call_operand.vmem [shape: f32[128,32], index: 1, kind: input, shape index: {}]   ;;  %s420_s2 = inlined_call_operand.vmem [shape: f32[1,32], index: 2, kind: input, shape index: {}]   ;;  %s421_s3 = inlined_call_operand.vmem [shape: f32[1,32], index: 3, kind: input, shape index: {}]   ;;  %s422_s4 = inlined_call_operand.vmem [shape: f32[1,32], index: 4, kind: input, shape index: {}]   ;;  %s423_s5 = inlined_call_operand.hbm [shape: f32[16,32], index: 5, kind: output, shape index: {}]  }
   0x1   :  { %v23_v0 = vld [vmem:[%s419_s1] sm:$0xff]  ;;  %v24_v1 = vld [vmem:[%s419_s1 + $0x8] sm:$0xff]  ;;  %v25_v2 = vld [vmem:[%s419_s1 + $0x10] sm:$0xff] }
   0x2   :  { %v241_v3 = vpack.c.bf16 %v24_v1, %v23_v0  ;;  %v26_v4 = vld [vmem:[%s419_s1 + $0x18] sm:$0xff]  ;;  %v27_v6 = vld [vmem:[%s419_s1 + $0x20] sm:$0xff]  ;;  %v28_v7 = vld [vmem:[%s419_s1 + $0x28] sm:$0xff] }
   0x3   :  { %v245_v5 = vpack.c.bf16 %v26_v4, %v25_v2  ;;  %v249_v8 = vpack.c.bf16 %v28_v7, %v27_v6  ;;  %v21_v9 = vld [vmem:[%s418_s0] sm:$0xff]  ;;  %v29_v10 = vld [vmem:[%s419_s1 + $0x30] sm:$0xff]  ;;  %v30_v11 = vld [vmem:[%s419_s1 + $0x38] sm:$0xff] }
   0x4   :  { %242 = vmatprep.subr.bf16.mxu0 %v241_v3  ;;  %238 = vmatprep.mubr.f32.mxu0 %v21_v9 }
   0x5   :  { %244 = vmatpush3.bf16.msra.mxu0 %v241_v3 }
   0x6   :  { %246 = vmatprep.subr.bf16.mxu0 %v245_v5 }
   0x7   :  { %10 = vsyncpa [#allocation3], 0  ;;  %v253_v12 = vpack.c.bf16 %v30_v11, %v29_v10  ;;  %v31_v13 = vld [vmem:[%s419_s1 + $0x40] sm:$0xff]  ;;  %v32_v14 = vld [vmem:[%s419_s1 + $0x48] sm:$0xff]  ;;  %vm121_vm0 = vcmask 261120   ;;  %s304_s7 = smov [#allocation2]  }
   0x8   :  { %v257_v15 = vpack.c.bf16 %v32_v14, %v31_v13  ;;  %v33_v16 = vld [vmem:[%s419_s1 + $0x50] sm:$0xff]  ;;  %v34_v17 = vld [vmem:[%s419_s1 + $0x58] sm:$0xff]  ;;  %v35_v19 = vld [vmem:[%s419_s1 + $0x60] sm:$0xff]  ;;  %s174_s8 = sshll.u32 %s304_s7, 4  ;;  %s175_s8 = int_to_ptr.vmem [resolvable:$true] %s174_s8 }
   0x9   :  { %248 = vmatpush3.bf16.msra.mxu0 %v245_v5  ;;  %v261_v18 = vpack.c.bf16 %v34_v17, %v33_v16  ;;  %v36_v20 = vld [vmem:[%s419_s1 + $0x68] sm:$0xff]  ;;  %v37_v22 = vld [vmem:[%s419_s1 + $0x70] sm:$0xff]  ;;  %v38_v23 = vld [vmem:[%s419_s1 + $0x78] sm:$0xff]  ;;  %s280_s9 = scalar_lea.vmem %s175_s8, 256  ;;  %p285_p1 = scmp.lt.s32.totalorder %s175_s8, %s175_s8 }
   0xa   :  { %250 = vmatprep.subr.bf16.mxu0 %v249_v8  ;;  %v265_v21 = vpack.c.bf16 %v36_v20, %v35_v19  ;;  %v269_v24 = vpack.c.bf16 %v38_v23, %v37_v22  ;;  %v22_v25 = vld [vmem:[%s418_s0 + $0x8] sm:$0xff]  ;;  %v185_v26 = vld [vmem:[%s420_s2] ss:$0 sm:$0xff]  ;;  %p281_p0 = scmp.ne.s32.totalorder %s175_s8, %s280_s9  ;;  %p286_p2 = scmp.lt.s32.totalorder %s280_s9, %s280_s9 }
   0xb   :  { %v186_v50 = vld [vmem:[%s421_s3] ss:$0 sm:$0xff] }
   0xc   :  { %v187_v52 = vld [vmem:[%s422_s4] ss:$0 sm:$0xff]  ;;  %p287_p3 = por %p286_p2, %p285_p1 }
   0xd   :  { %252 = vmatpush3.bf16.msra.mxu0 %v249_v8 }
   0xe   :  { %254 = vmatprep.subr.bf16.mxu0 %v253_v12  ;;  %p288_p4 = pnand %p287_p3, %p281_p0 }
  0x11   :  { %256 = vmatpush3.bf16.msra.mxu0 %v253_v12 }
  0x12   :  { %258 = vmatprep.subr.bf16.mxu0 %v257_v15 }
  0x15   :  { %260 = vmatpush3.bf16.msra.mxu0 %v257_v15 }
  0x16   :  { %262 = vmatprep.subr.bf16.mxu0 %v261_v18 }
  0x19   :  { %264 = vmatpush3.bf16.msra.mxu0 %v261_v18 }
  0x1a   :  { %266 = vmatprep.subr.bf16.mxu0 %v265_v21 }
  0x1d   :  { %268 = vmatpush3.bf16.msra.mxu0 %v265_v21 }
  0x1e   :  { %270 = vmatprep.subr.bf16.mxu0 %v269_v24 }
  0x21   :  { %272 = vmatpush3.bf16.msra.mxu0 %v269_v24 }
  0x24   :  { %239 = vmatmul.mubr.f32.vlgmr.msra.gmra.mrb[0].mxu0 %v22_v25 }
  0xf7   :  { %v240_v27 = vpop.f32.mrb[0].mxu0 }
  0xf8   :  { %v112_v28 = vpop.f32.mrb[1].mxu0  ;;  %v118_v30 = vadd.f32 %v240_v27, %v185_v26 }
  0xf9   :  { %v113_v29 = vadd.f32 %v185_v26, %v112_v28 }
  0xfa   :  { %v125_v32 = vsel %vm121_vm0, %v118_v30, 0.0 }
  0xfb   :  { %v122_v31 = vsel %vm121_vm0, %v113_v29, 0.0 }
  0xfc   :  { %123 = vadd.xlane.f32.xlu0 %v122_v31 }
 0x100   :  { %126 = vadd.xlane.f32.xlu0 %v125_v32 }
 0x189   :  { %v124_v33 = vpop.xlane.xlu0 %123 }
 0x18a   :  { %v129_v34 = vmul.f32 0.03125, %v124_v33 }
 0x18c   :  { %v131_v35 = vsub.f32 %v113_v29, %v129_v34 }
 0x18d   :  { %v127_v36 = vpop.xlane.xlu0 %126 }
 0x18e   :  { %v130_v37 = vmul.f32 0.03125, %v127_v36  ;;  %v133_v38 = vmul.f32 %v131_v35, %v131_v35 }
 0x190   :  { %v132_v39 = vsub.f32 %v118_v30, %v130_v37  ;;  %v135_v40 = vsel %vm121_vm0, %v133_v38, 0.0 }
 0x191   :  { %136 = vadd.xlane.f32.xlu1 %v135_v40 }
 0x192   :  { %v134_v41 = vmul.f32 %v132_v39, %v132_v39 }
 0x194   :  { %v138_v42 = vsel %vm121_vm0, %v134_v41, 0.0 }
 0x195   :  { %139 = vadd.xlane.f32.xlu1 %v138_v42 }
 0x21e   :  { %v137_v43 = vpop.xlane.xlu1 %136 }
 0x21f   :  { %v141_v44 = vmul.f32 0.03125, %v137_v43 }
 0x221   :  { %v143_v45 = vadd.f32 1e-12, %v141_v44 }
 0x222   :  { %v140_v46 = vpop.xlane.xlu1 %139 }
 0x223   :  { %276 = vrsqrt.f32 %v143_v45  ;;  %v142_v47 = vmul.f32 0.03125, %v140_v46 }
 0x225   :  { %v144_v48 = vadd.f32 1e-12, %v142_v47 }
 0x227   :  { %278 = vrsqrt.f32 %v144_v48 }
 0x22d   :  { %v277_v49 = vpop.eup %276 }
 0x22e   :  { %v147_v51 = vmul.f32 %v277_v49, %v131_v35 }
 0x230   :  { %v156_v53 = vmul.f32 %v186_v50, %v147_v51 }
 0x231   :  { %v279_v54 = vpop.eup %278 }
 0x232   :  { %v148_v55 = vmul.f32 %v279_v54, %v132_v39  ;;  %v165_v56 = vadd.f32 %v187_v52, %v156_v53 }
 0x234   :  { %v157_v57 = vmul.f32 %v186_v50, %v148_v55  ;;  %167 = vst.msk [vmem:[#allocation2] sm:$0xff] %vm121_vm0, %v165_v56 }
 0x236   :  { %v166_v58 = vadd.f32 %v187_v52, %v157_v57 }
 0x238   :  { %168 = vst.msk [vmem:[#allocation2 + $0x8] sm:$0xff] %vm121_vm0, %v166_v58 }
 0x239   :  { %291 = shalt.err (!%p288_p4)
}
 0x23a   :  { %s292_s10 = scalar_lea.hbm %s423_s5, 256 }
 0x23b   :  { %p293_p5 = scmp.ne.s32.totalorder %s423_s5, %s292_s10  ;;  %p296_p6 = scmp.lt.u32.totalorder %s292_s10, %s423_s5 }
 0x23d   :  { %p298_p7 = pnand %p296_p6, %p293_p5 }
 0x23f   :  { %301 = shalt.err (!%p298_p7)
}
 0x240   :  { %s305_s15 = smov 128   ;;  %s306_s16 = smov 8  }
 0x241   :  { %180 = dma.vmem_to_hbm [thread:$0]  %s175_s8, 256, %s423_s5, [#allocation3], %s305_s15, %s305_s15, %s306_s16  }
 0x242   :  { %302 = dma.done.wait [#allocation3], 256  }
 0x243   :  { %303 = vsyncadd [#allocation3], 4294967040 }
 0x244   :  { %184 = vsyncpa [#allocation3], 1 }

</bundles_post_ra>
